<compile_context>
chip_gen: v6e
topology: v6e:2x2x1
jax: 0.10.0
libtpu: 0.0.40
codegen_flags: <defaults>
</compile_context>

<pallas_src>
import functools

import jax
import jax.numpy as jnp
from jax.experimental import pallas as pl
from jax.experimental.pallas import tpu as pltpu


# --------------------------------------------------------------------------
# Helpers
# --------------------------------------------------------------------------

def _vmem_capacity_bytes():
    """Physical VMEM of the current TPU generation (conservative fallback)."""
    try:
        cap = int(pltpu.get_tpu_info().vmem_capacity_bytes)
        if cap >= (16 << 20):
            return cap
    except Exception:
        pass
    return 64 << 20        # v7x-sized fallback; v5e/v6e actually have 128 MiB.


def _clamp_vmem(need, capacity):
    return int(max(16 << 20, min(capacity - (1 << 20), max(int(need), 32 << 20))))


def _col_chunks(hw, target=2048, max_chunks=32):
    """Static, 128-aligned column chunks covering [0, hw)."""
    if hw <= target:
        return ((0, hw),)
    width = target
    if hw > width * max_chunks:
        width = ((hw + max_chunks - 1) // max_chunks + 127) // 128 * 128
    chunks = []
    lo = 0
    while lo < hw:
        chunks.append((lo, min(hw, lo + width)))
        lo += width
    return tuple(chunks)


def _mlp_gate(avg, mx, w1, w2):
    """sigmoid(fc2(relu(fc1(avg))) + fc2(relu(fc1(max)))); avg/mx: (C,1) -> (C,1)."""
    pooled = jnp.concatenate([avg, mx], axis=1)                      # (C, 2)
    w1 = w1.astype(jnp.float32)                                      # (Ch, C)
    w2 = w2.astype(jnp.float32)                                      # (C, Ch)
    h = jnp.dot(w1, pooled, preferred_element_type=jnp.float32)      # (Ch, 2)
    h = jnp.maximum(h, 0.0)
    o = jnp.dot(w2, h, preferred_element_type=jnp.float32)           # (C, 2)
    return jax.nn.sigmoid(o[:, 0:1] + o[:, 1:2])                     # (C, 1)


# --------------------------------------------------------------------------
# Fused single-block path: 1 HBM read of x + 1 HBM write, grid = (B,)
# --------------------------------------------------------------------------

def _fused_kernel(x_ref, w1_ref, w2_ref, o_ref, *, hw_total, col_chunks):
    # x_ref/o_ref block: (1, C, HW). Channels on sublanes, spatial on lanes.
    c = x_ref.shape[1]
    sum_acc = jnp.zeros((c, 1), jnp.float32)
    max_acc = jnp.full((c, 1), -jnp.inf, jnp.float32)

    # Single traversal: each static chunk is loaded once (upcast chunk-wise,
    # never the whole slab) and feeds BOTH the sum and the max accumulator.
    for lo, hi in col_chunks:
        xc = x_ref[0, :, lo:hi].astype(jnp.float32)                  # (C, w)
        sum_acc = sum_acc + jnp.sum(xc, axis=1, keepdims=True)
        max_acc = jnp.maximum(max_acc, jnp.max(xc, axis=1, keepdims=True))

    att = _mlp_gate(sum_acc * (1.0 / hw_total), max_acc,
                    w1_ref[...], w2_ref[...])                        # (C,1) f32
    att_d = att.astype(o_ref.dtype)                                  # cast once

    # Rescale in the I/O dtype (bf16 stays bf16); lane-dense stores.
    for lo, hi in col_chunks:
        o_ref[0, :, lo:hi] = x_ref[0, :, lo:hi] * att_d


def _fused_call(x, w1, w2, col_chunks, vmem_limit):
    B, C, HW = x.shape
    Ch = w1.shape[0]
    kernel = functools.partial(_fused_kernel, hw_total=HW, col_chunks=col_chunks)
    return pl.pallas_call(
        kernel,
        out_shape=jax.ShapeDtypeStruct((B, C, HW), x.dtype),
        grid_spec=pltpu.PrefetchScalarGridSpec(
            num_scalar_prefetch=0,
            grid=(B,),
            in_specs=[
                pl.BlockSpec((1, C, HW), lambda b: (b, 0, 0)),
                pl.BlockSpec((Ch, C), lambda b: (0, 0)),
                pl.BlockSpec((C, Ch), lambda b: (0, 0)),
            ],
            out_specs=pl.BlockSpec((1, C, HW), lambda b: (b, 0, 0)),
        ),
        compiler_params=pltpu.CompilerParams(
            dimension_semantics=("parallel",),
            vmem_limit_bytes=int(vmem_limit)),
    )(x, w1, w2)


# --------------------------------------------------------------------------
# Tiled two-pass fallback for slabs that don't fit VMEM
# --------------------------------------------------------------------------

def _stats_kernel(x_ref, w1_ref, w2_ref, att_ref, sum_sc, max_sc, *,
                  hw_total, tile_hw):
    t = pl.program_id(1)

    @pl.when(t == 0)
    def _():
        sum_sc[...] = jnp.zeros_like(sum_sc)
        max_sc[...] = jnp.full_like(max_sc, -jnp.inf)

    x = x_ref[0].astype(jnp.float32)                                 # (C, tile_hw)
    if hw_total % tile_hw != 0:
        # Boundary tile: mask columns beyond HW (they hold undefined data).
        col = t * tile_hw + jax.lax.broadcasted_iota(jnp.int32, x.shape, 1)
        valid = col < hw_total
        xs = jnp.where(valid, x, 0.0)
        xm = jnp.where(valid, x, -jnp.inf)
    else:
        xs, xm = x, x
    sum_sc[...] = sum_sc[...] + jnp.sum(xs, axis=1, keepdims=True)
    max_sc[...] = jnp.maximum(max_sc[...], jnp.max(xm, axis=1, keepdims=True))

    @pl.when(t == pl.num_programs(1) - 1)
    def _():
        avg = sum_sc[...] * (1.0 / hw_total)
        att_ref[0] = _mlp_gate(avg, max_sc[...], w1_ref[...], w2_ref[...])


def _scale_kernel(x_ref, att_ref, o_ref):
    x = x_ref[0]                                   # (C, tile_hw), I/O dtype
    att = att_ref[0].astype(x.dtype)               # (C, 1): one tiny cast/block
    # NOTE: on a boundary HW tile the padded columns hold undefined data;
    # correctness relies on Pallas clipping the out-of-range columns of a
    # partial output block, so multiplying the padded columns is harmless.
    o_ref[0] = x * att


def _tiled_call(x, w1, w2, tile_hw, vmem_limit):
    B, C, HW = x.shape
    Ch = w1.shape[0]
    T = pl.cdiv(HW, tile_hw)

    # Pass 1: per-batch channel stats + squeeze/excite gate -> att (B, C, 1) f32.
    att = pl.pallas_call(
        functools.partial(_stats_kernel, hw_total=HW, tile_hw=tile_hw),
        out_shape=jax.ShapeDtypeStruct((B, C, 1), jnp.float32),
        grid_spec=pltpu.PrefetchScalarGridSpec(
            num_scalar_prefetch=0,
            grid=(B, T),
            in_specs=[
                pl.BlockSpec((1, C, tile_hw), lambda b, t: (b, 0, t)),
                pl.BlockSpec((Ch, C), lambda b, t: (0, 0)),
                pl.BlockSpec((C, Ch), lambda b, t: (0, 0)),
            ],
            out_specs=pl.BlockSpec((1, C, 1), lambda b, t: (b, 0, 0)),
            scratch_shapes=[pltpu.VMEM((C, 1), jnp.float32),
                            pltpu.VMEM((C, 1), jnp.float32)],
        ),
        compiler_params=pltpu.CompilerParams(
            dimension_semantics=("parallel", "arbitrary"),
            vmem_limit_bytes=int(vmem_limit)),
    )(x, w1, w2)

    # Pass 2: lane-dense elementwise rescale, fully parallel over (b, hw-tile),
    # so both v7x TensorCores get work even when B == 1.
    return pl.pallas_call(
        _scale_kernel,
        out_shape=jax.ShapeDtypeStruct((B, C, HW), x.dtype),
        grid_spec=pltpu.PrefetchScalarGridSpec(
            num_scalar_prefetch=0,
            grid=(B, T),
            in_specs=[
                pl.BlockSpec((1, C, tile_hw), lambda b, t: (b, 0, t)),
                pl.BlockSpec((1, C, 1), lambda b, t: (b, 0, 0)),
            ],
            out_specs=pl.BlockSpec((1, C, tile_hw), lambda b, t: (b, 0, t)),
        ),
        compiler_params=pltpu.CompilerParams(
            dimension_semantics=("parallel", "parallel"),
            vmem_limit_bytes=int(vmem_limit)),
    )(x, att)


# --------------------------------------------------------------------------
# Wrapper
# --------------------------------------------------------------------------

def channel_attention(x_nchw, w1, w2, *, vmem_budget=None):
    """ChannelAttention forward. x: (B,C,H,W); w1: (C//16, C); w2: (C, C//16)."""
    B, C, H, W = x_nchw.shape
    Ch = w1.shape[0]
    assert Ch >= 1 and w1.shape == (Ch, C) and w2.shape == (C, Ch)
    HW = H * W

    # Native layout: (B, C, HW) is a free, contiguous reshape of NCHW.
    x = x_nchw.reshape(B, C, HW)
    item = jnp.dtype(x.dtype).itemsize
    w_bytes = (w1.size * jnp.dtype(w1.dtype).itemsize
               + w2.size * jnp.dtype(w2.dtype).itemsize)

    capacity = _vmem_capacity_bytes()
    budget = int(0.75 * capacity) if vmem_budget is None else int(vmem_budget)

    slab = C * HW * item
    chunks = _col_chunks(HW)
    chunk_w = chunks[0][1] - chunks[0][0]
    # fused path working set: 2x in + 2x out double-buffered slabs (I/O dtype)
    # + chunk-sized f32 temps + double-buffered weights + margin.
    fused_need = 4 * slab + 2 * C * chunk_w * 4 + 4 * w_bytes + (1 << 20)

    if fused_need <= budget:
        out = _fused_call(x, w1, w2, chunks,
                          _clamp_vmem(fused_need + (4 << 20), capacity))
    else:
        # HW-tiled two-pass fallback (reads x twice).  Largest 128-multiple
        # tile that fits the budget, clamped to [128, 2048]; no divisor
        # search -- boundary tiles are masked / clipped instead.
        cap_cols = max(128, (budget // (8 * C * item)) // 128 * 128)
        tile_hw = min(2048, cap_cols)
        if HW <= tile_hw:
            tile_hw = HW
        # (Pathological huge-C / tiny-HW shapes would need a channel-tiled
        #  fallback; realistic channel counts fit comfortably.)
        tiled_need = 6 * C * tile_hw * item + 2 * C * tile_hw * 4 + 4 * w_bytes + (1 << 20)
        out = _tiled_call(x, w1, w2, tile_hw,
                          _clamp_vmem(tiled_need + (4 << 20), capacity))

    return out.reshape(B, C, H, W)


def channel_attention_ref(x, w1, w2):
    # Pure-JAX reference of the PyTorch forward (NCHW).
    avg = jnp.mean(x, axis=(2, 3), keepdims=True)            # (B,C,1,1)
    mx = jnp.max(x, axis=(2, 3), keepdims=True)              # (B,C,1,1)

    def mlp(p):
        h = jnp.einsum("bcij,hc->bhij", p, w1)               # fc1 (1x1 conv)
        h = jnp.maximum(h, 0.0)
        return jnp.einsum("bhij,ch->bcij", h, w2)            # fc2 (1x1 conv)

    att = jax.nn.sigmoid(mlp(avg) + mlp(mx))
    return x * att


if __name__ == "__main__":
    key = jax.random.PRNGKey(0)
    B, C, H, W = 2, 32, 16, 16          # C >= 16 (fc1 uses in_planes // 16)
    Ch = C // 16

    kx, k1, k2 = jax.random.split(key, 3)
    x = jax.random.normal(kx, (B, C, H, W), dtype=jnp.float32)
    # Conv2d(C, Ch, 1, bias=False) weight (Ch, C, 1, 1) with 1x1 dims dropped.
    w1 = jax.random.normal(k1, (Ch, C), dtype=jnp.float32) * (1.0 / jnp.sqrt(C))
    # Conv2d(Ch, C, 1, bias=False) weight (C, Ch, 1, 1) with 1x1 dims dropped.
    w2 = jax.random.normal(k2, (C, Ch), dtype=jnp.float32) * (1.0 / jnp.sqrt(Ch))

    ref = channel_attention_ref(x, w1, w2)

    # 1) Fused single-block path (auto-selected), f32 I/O.
    out = jax.block_until_ready(channel_attention(x, w1, w2))
    assert out.shape == (B, C, H, W)
    assert jnp.allclose(out, ref, atol=1e-5, rtol=1e-5)

    # 2) HW-tiled two-pass fallback (forced via tiny budget) — must match too.
    out_tiled = jax.block_until_ready(channel_attention(x, w1, w2, vmem_budget=1))
    assert jnp.allclose(out_tiled, ref, atol=1e-5, rtol=1e-5)

    # 3) Non-128-multiple spatial size: exercises boundary masking (stats pass)
    #    and partial-output-block clipping (scale pass) on the tiled path.
    x2 = jax.random.normal(kx, (1, C, 20, 20), dtype=jnp.float32)
    ref2 = channel_attention_ref(x2, w1, w2)
    out2t = jax.block_until_ready(channel_attention(x2, w1, w2, vmem_budget=1))
    assert jnp.allclose(out2t, ref2, atol=1e-5, rtol=1e-5)
    out2f = jax.block_until_ready(channel_attention(x2, w1, w2))
    assert jnp.allclose(out2f, ref2, atol=1e-5, rtol=1e-5)

    # 4) bf16 I/O (half the HBM traffic); stats in f32, rescale stays in bf16.
    xb = x.astype(jnp.bfloat16)
    out_bf16 = jax.block_until_ready(channel_attention(xb, w1, w2))
    assert jnp.allclose(out_bf16.astype(jnp.float32), ref, atol=5e-2, rtol=5e-2)
    out_bf16_t = jax.block_until_ready(channel_attention(xb, w1, w2, vmem_budget=1))
    assert jnp.allclose(out_bf16_t.astype(jnp.float32), ref, atol=5e-2, rtol=5e-2)

    print("KERNEL_OK")
</pallas_src>

<mosaic_0001>
module attributes {stable_mosaic.version = 11 : i64} {
  func.func @_fused_kernel(%arg0: i32, %arg1: memref<1x32x256xf32, #tpu.memory_space<vmem>>, %arg2: memref<2x32xf32, #tpu.memory_space<vmem>>, %arg3: memref<32x2xf32, #tpu.memory_space<vmem>>, %arg4: memref<1x32x256xf32, #tpu.memory_space<vmem>>) attributes {dimension_semantics = [#tpu.dimension_semantics<parallel>], iteration_bounds = array<i64: 2>, scalar_prefetch = 0 : i64, scratch_operands = 0 : i64, tpu.core_type = #tpu.core_type<tc>, window_params = [{transform_indices = @transform_0, window_bounds = array<i64: 1, 32, 256>}, {pipeline_mode = #tpu.pipeline_mode<synchronous>, transform_indices = @transform_1, window_bounds = array<i64: 2, 32>}, {pipeline_mode = #tpu.pipeline_mode<synchronous>, transform_indices = @transform_2, window_bounds = array<i64: 32, 2>}, {transform_indices = @transform_3, window_bounds = array<i64: 1, 32, 256>}]} {
    %cst = arith.constant 0.000000e+00 : f32
    %0 = vector.broadcast %cst : f32 to vector<32x1xf32>
    %cst_0 = arith.constant 0xFF800000 : f32
    %1 = vector.broadcast %cst_0 : f32 to vector<32x1xf32>
    %c0 = arith.constant 0 : index
    %c0_1 = arith.constant 0 : index
    %c0_2 = arith.constant 0 : index
    %2 = vector.load %arg1[%c0, %c0_1, %c0_2] : memref<1x32x256xf32, #tpu.memory_space<vmem>>, vector<1x32x256xf32>
    %3 = vector.shape_cast %2 : vector<1x32x256xf32> to vector<32x256xf32>
    %cst_3 = arith.constant dense<0.000000e+00> : vector<32xf32>
    %4 = vector.multi_reduction <add>, %3, %cst_3 [1] : vector<32x256xf32> to vector<32xf32>
    %5 = vector.shape_cast %4 : vector<32xf32> to vector<32x1xf32>
    %6 = arith.addf %0, %5 : vector<32x1xf32>
    %cst_4 = arith.constant dense<0xFF800000> : vector<32xf32>
    %7 = vector.multi_reduction <maximumf>, %3, %cst_4 [1] : vector<32x256xf32> to vector<32xf32>
    %8 = vector.shape_cast %7 : vector<32xf32> to vector<32x1xf32>
    %9 = arith.maximumf %1, %8 : vector<32x1xf32>
    %cst_5 = arith.constant 3.906250e-03 : f32
    %10 = vector.broadcast %cst_5 : f32 to vector<32x1xf32>
    %11 = arith.mulf %6, %10 : vector<32x1xf32>
    %c0_6 = arith.constant 0 : index
    %c0_7 = arith.constant 0 : index
    %12 = vector.load %arg2[%c0_6, %c0_7] : memref<2x32xf32, #tpu.memory_space<vmem>>, vector<2x32xf32>
    %c0_8 = arith.constant 0 : index
    %c0_9 = arith.constant 0 : index
    %13 = vector.load %arg3[%c0_8, %c0_9] : memref<32x2xf32, #tpu.memory_space<vmem>>, vector<32x2xf32>
    %14 = tpu.concatenate %11, %9 in 1 : vector<32x1xf32>, vector<32x1xf32> -> vector<32x2xf32>
    %cst_10 = arith.constant dense<0.000000e+00> : vector<2x2xf32>
    %15 = tpu.matmul %12, %14, %cst_10 {dimension_numbers = #tpu.dot_dimension_numbers<[1], [0], [0], [1], [0, 0, 1, 1], [], []>} : vector<2x32xf32>, vector<32x2xf32>, vector<2x2xf32> -> vector<2x2xf32>
    %cst_11 = arith.constant 0.000000e+00 : f32
    %16 = vector.broadcast %cst_11 : f32 to vector<2x2xf32>
    %17 = arith.maximumf %15, %16 : vector<2x2xf32>
    %cst_12 = arith.constant dense<0.000000e+00> : vector<32x2xf32>
    %18 = tpu.matmul %13, %17, %cst_12 {dimension_numbers = #tpu.dot_dimension_numbers<[1], [0], [0], [1], [0, 0, 1, 1], [], []>} : vector<32x2xf32>, vector<2x2xf32>, vector<32x2xf32> -> vector<32x2xf32>
    %19 = vector.extract_strided_slice %18 {offsets = [0, 0], sizes = [32, 1], strides = [1, 1]} : vector<32x2xf32> to vector<32x1xf32>
    %20 = vector.extract_strided_slice %18 {offsets = [0, 1], sizes = [32, 1], strides = [1, 1]} : vector<32x2xf32> to vector<32x1xf32>
    %21 = arith.addf %19, %20 : vector<32x1xf32>
    %22 = arith.negf %21 : vector<32x1xf32>
    %23 = math.exp %22 : vector<32x1xf32>
    %cst_13 = arith.constant 1.000000e+00 : f32
    %24 = vector.broadcast %cst_13 : f32 to vector<32x1xf32>
    %25 = arith.addf %24, %23 : vector<32x1xf32>
    %26 = arith.divf %24, %25 : vector<32x1xf32>
    %c0_14 = arith.constant 0 : index
    %c0_15 = arith.constant 0 : index
    %c0_16 = arith.constant 0 : index
    %27 = vector.load %arg1[%c0_14, %c0_15, %c0_16] : memref<1x32x256xf32, #tpu.memory_space<vmem>>, vector<1x32x256xf32>
    %28 = vector.shape_cast %27 : vector<1x32x256xf32> to vector<32x256xf32>
    %29 = vector.broadcast %26 : vector<32x1xf32> to vector<32x256xf32>
    %30 = arith.mulf %28, %29 : vector<32x256xf32>
    %c0_17 = arith.constant 0 : index
    %c0_18 = arith.constant 0 : index
    %c0_19 = arith.constant 0 : index
    %31 = vector.load %arg4[%c0_17, %c0_18, %c0_19] : memref<1x32x256xf32, #tpu.memory_space<vmem>>, vector<1x32x256xf32>
    %32 = vector.shape_cast %31 : vector<1x32x256xf32> to vector<32x256xf32>
    %33 = vector.shape_cast %30 : vector<32x256xf32> to vector<1x32x256xf32>
    tpu.vector_store %arg4[%c0_17, %c0_18, %c0_19], %33 {strides = array<i32>} : memref<1x32x256xf32, #tpu.memory_space<vmem>>, vector<1x32x256xf32>,
    return
  }
  func.func @transform_0(%arg0: i32) -> (i32, i32, i32) {
    %c0_i32 = arith.constant 0 : i32
    %c0_i32_0 = arith.constant 0 : i32
    %c0_i32_1 = arith.constant 0 : i32
    return %arg0, %c0_i32, %c0_i32_0 : i32, i32, i32
  }
  func.func @transform_1(%arg0: i32) -> (i32, i32) {
    %c0_i32 = arith.constant 0 : i32
    %c0_i32_0 = arith.constant 0 : i32
    %c0_i32_1 = arith.constant 0 : i32
    return %c0_i32, %c0_i32_0 : i32, i32
  }
  func.func @transform_2(%arg0: i32) -> (i32, i32) {
    %c0_i32 = arith.constant 0 : i32
    %c0_i32_0 = arith.constant 0 : i32
    %c0_i32_1 = arith.constant 0 : i32
    return %c0_i32, %c0_i32_0 : i32, i32
  }
  func.func @transform_3(%arg0: i32) -> (i32, i32, i32) {
    %c0_i32 = arith.constant 0 : i32
    %c0_i32_0 = arith.constant 0 : i32
    %c0_i32_1 = arith.constant 0 : i32
    return %arg0, %c0_i32, %c0_i32_0 : i32, i32, i32
  }
}

</mosaic_0001>

<bundles_post_ra>
// kernel: tpu_custom_call.1
= control target key start
LH: loop header
LB: loop body
LE: loop exit
PB: predicated region body
PF: predicated region fallthrough
CT: control target
= control target key end

     0   :  { %8 = vsyncpa [#allocation3], 0  ;;  %s1051_s0 = inlined_call_operand.hbm [shape: f32[2,32,256], index: 0, kind: input, shape index: {}]   ;;  %s1052_s1 = inlined_call_operand.vmem [shape: f32[2,32], index: 1, kind: input, shape index: {}]   ;;  %s1053_s2 = inlined_call_operand.vmem [shape: f32[32,2], index: 2, kind: input, shape index: {}]   ;;  %s1054_s3 = inlined_call_operand.hbm [shape: f32[2,32,256], index: 3, kind: output, shape index: {}]  }
   0x1   :  { %10 = vsyncpa [#allocation3 + $0x1], 0 }
   0x2   :  { %11 = vsyncpa [#allocation4], 0 }
   0x3   :  { %13 = vsyncpa [#allocation4 + $0x1], 0  ;;  %s834_s12 = smov 0   ;;  %s836_s13 = smov 0  }
   0x4   :  { %s838_s14 = smov 0   ;;  %s840_s15 = smov 0  }
   0x5 LB: > { %s855_s16 = sadd.s32 4294967295, %s802_s15   ;;  %s583_s17 = sadd.s32 4294967294, %s802_s15   ;;  %s802_s15 = sphi %s840_s15, %s1069_s15   ;;  %s798_s14 = sphi %s838_s14, %s1068_s14   ;;  %s794_s13 = sphi %s836_s13, %s1067_s13   ;;  %s790_s12 = sphi %s834_s12, %s1066_s12  }
   0x6   : > { %s859_s18 = sadd.s32 1, %s802_s15   ;;  %s26_s19 = sadd.s32 1, %s798_s14 }
   0x7   : > { %s23_s20 = ssub.s32 %s802_s15, %s859_s18  ;;  %p33_p0 = scmp.ne.s32.totalorder %s798_s14, %s794_s13 }
   0x8   : > { %p24_p1 = scmp.eq.s32.totalorder %s23_s20, 0  ;;  %p34_p2 = scmp.eq.s32.totalorder %s802_s15, 0 }
   0x9   : > { %p39_p3 = scmp.ne.s32.totalorder %s794_s13, %s790_s12  ;;  %p40_p4 = scmp.eq.s32.totalorder %s855_s16, 0 }
   0xa   : > { %s871_s21 = scalar_select %p24_p1, %s798_s14, %s26_s19  }
   0xb   : > { %p873_p5 = por %p34_p2, %p33_p0  ;;  %p877_p6 = por %p40_p4, %p39_p3 }
   0xc   : > { %p105_p7 = scmp.eq.s32.totalorder %s855_s16, 1  ;;  %p111_p8 = scmp.eq.s32.totalorder %s583_s17, 1 }
   0xd   : > { %s1058_s23 = scalar_select %p877_p6, 1, 0 }
   0xe   : > { %p650_p10 = scmp.lt.s32.totalorder %s802_s15, 2  ;;  %p884_p11 = por %p105_p7, %p33_p0 }
   0xf   : > { %p888_p12 = por %p111_p8, %p39_p3  ;;  %s137_s26 = sand.u32 1, %s798_s14  }
  0x10   : > { %s1059_s24 = scalar_select %p884_p11, 1, 0 }
  0x11   : > { %s1060_s25 = scalar_select %p888_p12, 1, 0 }
  0x12   : > { %s607_s27 = sshll.u32 %s802_s15, 10  ;;  %s586_s28 = sshll.u32 %s137_s26, 6 }
  0x13   : > { %s897_s4 = scalar_lea.hbm %s1051_s0, %s607_s27  ;;  %s141_s5 = scalar_lea.vmem [#allocation2], %s586_s28 }
  0x14   : > { %s148_s6 = sshll.u32 %s141_s5, 4  ;;  %p901_p13 = pnand %p650_p10, %p873_p5  ;;  %s905_s6 = int_to_ptr.vmem [resolvable:$true] %s148_s6 }
  0x15   : > { %s907_s8 = scalar_lea.sflag [#allocation3], %s137_s26  ;;  %s710_s9 = scalar_lea.hbm %s897_s4, 1024 }
  0x16   : > { %p711_p0 = scmp.ne.s32.totalorder %s897_s4, %s710_s9  ;;  %p712_p1 = pneg %p901_p13 }
  0x17   : > { %s715_s17 = scalar_lea.hbm %s1051_s0, 2048  ;;  %p716_p4 = scmp.lt.s32.totalorder %s897_s4, %s1051_s0 }
  0x18   : > { %p713_p2 = pnand %p712_p1, %p711_p0  ;;  %p717_p5 = scmp.lt.s32.totalorder %s715_s17, %s710_s9 }
  0x1a   : > { %p714_p3 = pneg %p713_p2  ;;  %p718_p7 = por %p717_p5, %p716_p4 }
  0x1c   : > { %p719_p8 = pnand %p718_p7, %p714_p3 }
  0x1e   : > { %722 = shalt.err (!%p719_p8)
}
  0x1f   : > { %s723_s22 = scalar_lea.vmem %s905_s6, 1024  ;;  %s804_s26 = smov [#allocation2]  }
  0x20   : > { %p724_p10 = scmp.ne.s32.totalorder %s905_s6, %s723_s22  ;;  %s728_s27 = sshll.u32 %s804_s26, 4  ;;  %s729_s27 = int_to_ptr.vmem [resolvable:$false] %s728_s27 }
  0x21   : > { %s730_s28 = scalar_lea.vmem %s729_s27, 2048  ;;  %p731_p2 = scmp.lt.s32.totalorder %s905_s6, %s729_s27 }
  0x22   : > { %p726_p9 = pnand %p724_p10, %p712_p1  ;;  %p732_p12 = scmp.lt.s32.totalorder %s730_s28, %s723_s22 }
  0x24   : > { %p727_p0 = pneg %p726_p9  ;;  %p733_p11 = por %p732_p12, %p731_p2 }
  0x26   : > { %p734_p6 = pnand %p733_p11, %p727_p0 }
  0x28   : > { %737 = shalt.err (!%p734_p6)
}
  0x29   : > { %s805_s29 = smov 256   ;;  %s806_s30 = smov 16  }
  0x2a   : > { %645 = dma.hbm_to_vmem [thread:$0]  (!%p901_p13), %s897_s4, 1024, %s905_s6, %s907_s8, %s805_s29, %s805_s29, %s806_s30  }
  0x2b   : > { %p589_p9 = scmp.ge.s32.totalorder %s802_s15, 1  ;;  %p156_p1 = scmp.lt.s32.totalorder %s802_s15, 3 }
  0x2d   : > { %p157_p3 = pnand %p589_p9, %p156_p1 }
  0x2e   : > { %s931_s5 = sand.u32 (!%p157_p3), 1, %s794_s13   ;;  %p1062_p6 = scmp.ne.s32.totalorder (!%p157_p3), %s1058_s23, 0 }
  0x2f   : > { %160 = sbr.rel (%p157_p3) target bundleno = 899 (0x383), region = 32  ;;  %s590_s9 = sshll.u32 (!%p157_p3), %s931_s5, 6 }
  0x30   : > { %s163_s10 = scalar_lea.sflag (!%p157_p3), [#allocation3], %s931_s5  ;;  %s166_s11 = scalar_lea.vmem (!%p157_p3), [#allocation2], %s590_s9 }
  0x34   : > { %781 = dma.done.wait (%p1062_p6), %s163_s10, 1024  }
  0x35   : > { %783 = vsyncadd (%p1062_p6), %s163_s10, 4294966272  ;;  %v941_v0 = vld [vmem:[%s166_s11 + $0x30] sm:$0xff]  ;;  %v943_v1 = vld [vmem:[%s166_s11 + $0x38] sm:$0xff]  ;;  %v807_v16 = vmov 0.0   ;;  %vm808_vm0 = vmmov 0   ;;  %vm234_vm1 = vcmask 7168  }
  0x36   : > { %v945_v2 = vld [vmem:[%s166_s11 + $0x20] sm:$0xff]  ;;  %v222_v3 = vmax.f32 %v941_v0, %v943_v1  ;;  %v206_v4 = vadd.f32 %v943_v1, %v941_v0  ;;  %v951_v5 = vld [vmem:[%s166_s11 + $0x28] sm:$0xff]  ;;  %v953_v6 = vld [vmem:[%s166_s11 + $0x10] sm:$0xff]  ;;  %619 = vmatprep.subr.mxu0 %v807_v16  ;;  %627 = vmatprep.mubr.msk.f32.mxu0 %vm808_vm0, %v807_v16  ;;  %vm239_vm2 = vcmask 261120   ;;  %vm314_vm3 = vcmask 15360   ;;  %s809_s27 = smov 127  }
  0x37   : > { %v955_v7 = vld [vmem:[%s166_s11 + $0x18] sm:$0xff]  ;;  %v203_v8 = vadd.f32 %v951_v5, %v945_v2  ;;  %v961_v10 = vld [vmem:[%s166_s11] sm:$0xff]  ;;  %v963_v11 = vld [vmem:[%s166_s11 + $0x8] sm:$0xff]  ;;  %v219_v12 = vmax.f32 %v945_v2, %v951_v5  ;;  %vm327_vm4 = vcmask 1041408   ;;  %v810_v45 = vmov 0   ;;  %s188_s28 = scalar_lea.vmem [#allocation5], %s590_s9 }
  0x38   : > { %223 = vmax.xlane.f32.xlu1 %v222_v3  ;;  %207 = vadd.xlane.f32.xlu0 %v206_v4  ;;  %v200_v9 = vadd.f32 %v955_v7, %v953_v6  ;;  %v197_v13 = vadd.f32 %v963_v11, %v961_v10  ;;  %v216_v14 = vmax.f32 %v953_v6, %v955_v7  ;;  %v229_v32 = vld [vmem:[%s1052_s1] sm:$0x3]  ;;  %v231_v38 = vld [vmem:[%s1053_s2 + $0x8] sm:$0xff]  ;;  %v232_v39 = vld [vmem:[%s1053_s2 + $0x10] sm:$0xff]  ;;  %s510_s29 = sshll.u32 %s188_s28, 4  ;;  %s608_s30 = sshll.u32 %s855_s16, 10  ;;  %s1001_s29 = int_to_ptr.vmem [resolvable:$true] %s510_s29 }
  0x39   : > { %v213_v15 = vmax.f32 %v961_v10, %v963_v11  ;;  %v230_v34 = vld [vmem:[%s1053_s2] sm:$0xff]  ;;  %v233_v40 = vld [vmem:[%s1053_s2 + $0x18] sm:$0xff]  ;;  %692 = vset.pattern.permute.xlu1 %v810_v45  ;;  %693 = vset.pattern.permute.xlu0 %v810_v45  ;;  %s1006_s11 = scalar_lea.hbm %s1054_s3, %s608_s30  ;;  %s497_s16 = scalar_lea.sflag [#allocation4], %s931_s5 }
  0x3a   : > { %632 = vmatprep.mubr.msk.f32.mxu1 %vm314_vm3, %v230_v34  ;;  %s738_s23 = scalar_lea.vmem %s1001_s29, 1024  ;;  %p1063_p12 = scmp.ne.s32.totalorder %s1059_s24, 0 }
  0x3b   : > { %p739_p11 = scmp.ne.s32.totalorder %s1001_s29, %s738_s23  ;;  %s811_s4 = smov [#allocation5]  }
  0x3c   : > { %204 = vadd.xlane.f32.xlu0 %v203_v8  ;;  %201 = vadd.xlane.f32.xlu1 %v200_v9  ;;  %s742_s6 = sshll.u32 %s811_s4, 4  ;;  %s743_s6 = int_to_ptr.vmem [resolvable:$false] %s742_s6 }
  0x3d   : > { %p740_p13 = pnand %p739_p11, %p1063_p12  ;;  %s744_s7 = scalar_lea.vmem %s743_s6, 2048 }
  0x3e   : > { %p745_p5 = scmp.lt.s32.totalorder %s1001_s29, %s743_s6  ;;  %p746_p7 = scmp.lt.s32.totalorder %s744_s7, %s738_s23 }
  0x3f   : > { %p741_p4 = pneg %p740_p13 }
  0x40   : > { %220 = vmax.xlane.f32.xlu0 %v219_v12  ;;  %198 = vadd.xlane.f32.xlu1 %v197_v13  ;;  %p747_p8 = por %p746_p7, %p745_p5 }
  0x42   : > { %p748_p10 = pnand %p747_p8, %p741_p4 }
  0x44   : > { %217 = vmax.xlane.f32.xlu0 %v216_v14  ;;  %214 = vmax.xlane.f32.xlu1 %v213_v15 }
  0xc1   : > { %v224_v17 = vpop.xlane.xlu1 %223  ;;  %v208_v18 = vpop.xlane.xlu0 %207 }
  0xc2   : > { %v228_v19 = vmul.f32 0.00390625, %v208_v18 }
  0xc4   : > { %v238_v20 = vsel %vm234_vm1, %v228_v19, %v224_v17 }
  0xc5   : > { %620 = vmatpush3.msra.mxu0 %v238_v20  ;;  %v205_v21 = vpop.xlane.xlu0 %204  ;;  %v202_v22 = vpop.xlane.xlu1 %201 }
  0xc6   : > { %621 = vmatprep.subr.mxu0 %v807_v16  ;;  %v227_v23 = vmul.f32 0.00390625, %v205_v21  ;;  %v226_v27 = vmul.f32 0.00390625, %v202_v22 }
  0xc9   : > { %v221_v24 = vpop.xlane.xlu0 %220  ;;  %v199_v25 = vpop.xlane.xlu1 %198 }
  0xca   : > { %v237_v26 = vsel %vm234_vm1, %v227_v23, %v221_v24  ;;  %v225_v28 = vmul.f32 0.00390625, %v199_v25 }
  0xcb   : > { %622 = vmatpush3.msra.mxu0 %v237_v26 }
  0xcc   : > { %623 = vmatprep.subr.mxu0 %v807_v16 }
  0xcd   : > { %v218_v29 = vpop.xlane.xlu0 %217  ;;  %v215_v30 = vpop.xlane.xlu1 %214 }
  0xce   : > { %v236_v31 = vsel %vm234_vm1, %v226_v27, %v218_v29  ;;  %v235_v33 = vsel %vm234_vm1, %v225_v28, %v215_v30 }
  0xcf   : > { %624 = vmatpush3.msra.mxu0 %v236_v31 }
  0xd0   : > { %625 = vmatprep.subr.mxu0 %v807_v16 }
  0xd1   : > { %626 = vmatpush3.msra.mxu0 %v235_v33 }
  0xd2   : > { %628 = vmatmul.mubr.msk.f32.vlgmr.msra.gmra.mxu0 %vm239_vm2, %v229_v32 }
 0x192   : > { %v309_v35 = vpop.f32.mrf.mxu0 }
 0x193   : > { %v313_v36 = vmax.f32 %v309_v35, 0.0 }
 0x194   : > { %v629_v37 = vpop.f32.mrf.mxu0 }
 0x195   : > { %630 = vmatprep.subr.msk.mxu1 %vm327_vm4, %v313_v36 }
 0x196   : > { %631 = vmatpush3.msk.msra.mxu1 %vm327_vm4, %v313_v36 }
 0x197   : > { %633 = vmatmul.mubr.msk.f32.vlgmr.msra.gmra.mxu1 %vm314_vm3, %v231_v38 }
 0x198   : > { %635 = vmatprep.mubr.msk.f32.mxu1 %vm314_vm3, %v232_v39 }
 0x19b   : > { %636 = vmatmul.mubr.msk.f32.gmra.mxu1 %vm314_vm3, %v233_v40 }
 0x257   : > { %v634_v41 = vpop.f32.mrf.mxu1 }
 0x258   : > { %422 = vrot.lane.b32.xlu1 %v634_v41, %s809_s27 }
 0x259   : > { %v397_v42 = vpop.f32.mrf.mxu1 }
 0x25a   : > { %420 = vrot.lane.b32.xlu0 %v397_v42, %s809_s27 }
 0x25b   : > { %v637_v43 = vpop.f32.mrf.mxu1 }
 0x25d   : > { %v407_v44 = vpop.f32.mrf.mxu1 }
 0x25e   : > { %424 = vrot.lane.b32.xlu1 %v407_v44, %s809_s27 }
 0x262   : > { %426 = vrot.lane.b32.xlu1 %v637_v43, %s809_s27 }
 0x2ca   : > { %v423_v46 = vpop.permute.xlu1 %422 }
 0x2cb   : > { %v433_v47 = vadd.f32 %v634_v41, %v423_v46 }
 0x2cc   : > { %v421_v48 = vpop.permute.xlu0 %420 }
 0x2cd   : > { %v599_v49 = vmul.f32 -1.442695, %v433_v47  ;;  %v432_v50 = vadd.f32 %v421_v48, %v397_v42 }
 0x2cf   : > { %694 = vpow2.f32 %v599_v49  ;;  %v598_v51 = vmul.f32 -1.442695, %v432_v50 }
 0x2d0   : > { %v425_v52 = vpop.permute.xlu1 %424 }
 0x2d1   : > { %696 = vpow2.f32 %v598_v51  ;;  %v434_v53 = vadd.f32 %v425_v52, %v407_v44 }
 0x2d3   : > { %v600_v54 = vmul.f32 -1.442695, %v434_v53 }
 0x2d4   : > { %v427_v55 = vpop.permute.xlu1 %426 }
 0x2d5   : > { %698 = vpow2.f32 %v600_v54  ;;  %v435_v56 = vadd.f32 %v637_v43, %v427_v55 }
 0x2d7   : > { %v601_v57 = vmul.f32 -1.442695, %v435_v56 }
 0x2d9   : > { %700 = vpow2.f32 %v601_v57 }
 0x2dc   : > { %v695_v58 = vpop.eup %694 }
 0x2dd   : > { %v449_v59 = vadd.f32 1.0, %v695_v58 }
 0x2de   : > { %v697_v60 = vpop.eup %696 }
 0x2df   : > { %702 = vrcp.f32 %v449_v59  ;;  %v448_v61 = vadd.f32 1.0, %v697_v60 }
 0x2e1   : > { %704 = vrcp.f32 %v448_v61 }
 0x2e2   : > { %v699_v62 = vpop.eup %698 }
 0x2e3   : > { %v450_v63 = vadd.f32 1.0, %v699_v62 }
 0x2e5   : > { %706 = vrcp.f32 %v450_v63 }
 0x2e6   : > { %v701_v3 = vpop.eup %700 }
 0x2e7   : > { %v451_v4 = vadd.f32 1.0, %v701_v3 }
 0x2e9   : > { %708 = vrcp.f32 %v451_v4 }
 0x2ec   : > { %v703_v8 = vpop.eup %702 }
 0x2ed   : > { %467 = vperm.xlu1 %692, %v703_v8  }
 0x2ee   : > { %v705_v9 = vpop.eup %704 }
 0x2ef   : > { %462 = vperm.xlu0 %693, %v705_v9  }
 0x2f2   : > { %v707_v12 = vpop.eup %706 }
 0x2f3   : > { %472 = vperm.xlu1 %692, %v707_v12  }
 0x2f6   : > { %v709_v13 = vpop.eup %708 }
 0x2f7   : > { %477 = vperm.xlu0 %693, %v709_v13  }
 0x368   : > { %v468_v14 = vpop.permute.xlu1 %467 }
 0x369   : > { %v482_v15 = vmul.f32 %v468_v14, %v953_v6  ;;  %v483_v16 = vmul.f32 %v468_v14, %v955_v7 }
 0x36a   : > { %v463_v17 = vpop.permute.xlu0 %462 }
 0x36b   : > { %490 = vst [vmem:[%s188_s28 + $0x10] sm:$0xff] %v482_v15  ;;  %491 = vst [vmem:[%s188_s28 + $0x18] sm:$0xff] %v483_v16  ;;  %v480_v18 = vmul.f32 %v463_v17, %v961_v10  ;;  %v481_v19 = vmul.f32 %v463_v17, %v963_v11 }
 0x36d   : > { %488 = vst [vmem:[%s188_s28] sm:$0xff] %v480_v18  ;;  %489 = vst [vmem:[%s188_s28 + $0x8] sm:$0xff] %v481_v19 }
 0x36e   : > { %v473_v20 = vpop.permute.xlu1 %472 }
 0x36f   : > { %v484_v21 = vmul.f32 %v473_v20, %v945_v2  ;;  %v485_v6 = vmul.f32 %v473_v20, %v951_v5 }
 0x371   : > { %492 = vst [vmem:[%s188_s28 + $0x20] sm:$0xff] %v484_v21  ;;  %493 = vst [vmem:[%s188_s28 + $0x28] sm:$0xff] %v485_v6 }
 0x372   : > { %v478_v7 = vpop.permute.xlu0 %477 }
 0x373   : > { %v486_v10 = vmul.f32 %v478_v7, %v941_v0  ;;  %v487_v2 = vmul.f32 %v478_v7, %v943_v1 }
 0x375   : > { %494 = vst [vmem:[%s188_s28 + $0x30] sm:$0xff] %v486_v10  ;;  %495 = vst [vmem:[%s188_s28 + $0x38] sm:$0xff] %v487_v2 }
 0x376   : > { %751 = shalt.err (!%p748_p10)
}
 0x377   : > { %s752_s8 = scalar_lea.hbm %s1006_s11, 1024  ;;  %s756_s20 = scalar_lea.hbm %s1054_s3, 2048 }
 0x378   : > { %p753_p0 = scmp.ne.s32.totalorder %s1006_s11, %s752_s8  ;;  %p757_p1 = scmp.lt.s32.totalorder %s1006_s11, %s1054_s3 }
 0x379   : > { %p758_p3 = scmp.lt.s32.totalorder %s756_s20, %s752_s8 }
 0x37a   : > { %p754_p2 = pnand %p753_p0, %p1063_p12 }
 0x37b   : > { %p759_p6 = por %p758_p3, %p757_p1 }
 0x37c   : > { %p755_p9 = pneg %p754_p2 }
 0x37e   : > { %p760_p11 = pnand %p759_p6, %p755_p9 }
 0x380   : > { %763 = shalt.err (!%p760_p11)
}
 0x381   : > { %s812_s27 = smov 256   ;;  %s813_s28 = smov 16  }
 0x382   : > { %640 = dma.vmem_to_hbm [thread:$0]  (%p1063_p12), %s1001_s29, 1024, %s1006_s11, %s497_s16, %s812_s27, %s812_s27, %s813_s28  }
 0x383 PF: > { %s525_s30 = sand.u32 1, %s790_s12   ;;  %p1064_p13 = scmp.ne.s32.totalorder %s1060_s25, 0 }
 0x384   : > { %p1065_p4 = scmp.ge.s32.totalorder %s802_s15, 2  ;;  %s526_s9 = scalar_lea.sflag [#allocation4], %s525_s30 }
 0x386   : > { %p647_p5 = pnand %p1065_p4, %p1064_p13 }
 0x388   : > { %p648_p7 = pneg %p647_p5 }
 0x38a   : > { %785 = dma.done.wait (%p648_p7), %s526_s9, 1024  }
 0x38b   : > { %787 = vsyncadd (%p648_p7), %s526_s9, 4294966272  ;;  %p16_p8 = scmp.ge.s32.totalorder %s859_s18, 4   ;;  %s1066_s12 = smov %s794_s13 }
 0x38c   : > { %s1067_s13 = smov %s798_s14  ;;  %s1068_s14 = smov %s871_s21 }
 0x38d   : > { %s1069_s15 = smov %s859_s18  ;;  %18 = sbr.rel (!%p16_p8) target bundleno = 5 (0x5), region = 77 }
 0x392   :  { %531 = vsyncpa [#allocation3], 1 }
 0x393   :  { %533 = vsyncpa [#allocation3 + $0x1], 1 }
 0x394   :  { %534 = vsyncpa [#allocation4], 1 }
 0x395   :  { %536 = vsyncpa [#allocation4 + $0x1], 1 }

</bundles_post_ra>
